<compile_context>
chip_gen: v7x
topology: tpu7x:2x2x1
jax: 0.10.0
libtpu: 0.0.40
codegen_flags: <defaults>
</compile_context>

<pallas_src>
import functools

import numpy as np
import jax
import jax.numpy as jnp
from jax.experimental import pallas as pl
from jax.experimental.pallas import tpu as pltpu

C_IN, C_MID, K = 64, 32, 3
H = W = 3                       # implied by fc1.in_features == 32
NPOS = H * W                    # 9 spatial positions
FC1_OUT = 100
BN_EPS = 1e-5
LANE = 128
TB_MAX = 512                    # batch tile; fits VMEM on v5e/v6e/v7x (no im2col)
NEG_BIG = -1e9                  # bias for padded class columns


def _round_up(x, m):
    return ((x + m - 1) // m) * m


def _clf_kernel(x_ref, wconv_ref, bconv_ref, w1_ref, b1_ref, w2_ref, b2_ref,
                out_ref, *, approx_recip):
    # conv3 as a single (TB, 576) @ (576, 288) matmul; the (576, 288) matrix
    # encodes all 9 kernel taps incl. the zero padding (built at pack time).
    conv = jnp.dot(x_ref[...], wconv_ref[...],
                   preferred_element_type=jnp.float32)                # (TB, 9*32)

    # MaxPool2d(3) over the 9 positions: elementwise max of 9 contiguous
    # 32-lane slices.
    pooled = conv[:, 0:C_MID]
    for p in range(1, NPOS):
        pooled = jnp.maximum(pooled, conv[:, p * C_MID:(p + 1) * C_MID])

    # Conv bias + ReLU after the max (exact: x -> relu(x + b) is monotone).
    h = jnp.maximum(pooled + bconv_ref[...], 0.0)                     # (TB, 32)

    # BatchNorm2d (eval mode) is folded into fc1 at pack time.
    # Dropout2d(p=0.2) is identity in eval mode.
    # TODO(synk): training-mode Dropout2d / batch-statistics BatchNorm not implemented.

    # fc1 -> ReLU -> sigmoid  (fc1 output padded to 128 lanes; pad cols are
    # zero weight / zero bias and their fc2 rows are zero, so exact).
    h1 = jnp.dot(h.astype(w1_ref.dtype), w1_ref[...],
                 preferred_element_type=jnp.float32) + b1_ref[...]    # (TB, 128)
    h1 = jnp.maximum(h1, 0.0)
    h1 = pl.reciprocal(1.0 + jnp.exp(-h1), approx=approx_recip)       # sigmoid

    # fc2 -> softmax (padded class columns have bias -1e9 -> exp == 0).
    logits = jnp.dot(h1.astype(w2_ref.dtype), w2_ref[...],
                     preferred_element_type=jnp.float32) + b2_ref[...]  # (TB, 128)
    m = jnp.max(logits, axis=-1, keepdims=True)
    e = jnp.exp(logits - m)
    out_ref[...] = e * pl.reciprocal(jnp.sum(e, axis=-1, keepdims=True),
                                     approx=approx_recip)


def main_clf_forward(x_nchw, params, class_count, *, approx_recip=False):
    B = x_nchw.shape[0]
    assert x_nchw.shape[1:] == (C_IN, H, W), "forward implies input (B, 64, 3, 3)"
    kin = NPOS * C_IN                    # 576
    kmid = NPOS * C_MID                  # 288
    fc1_pad = params["w1"].shape[1]      # 128
    ncls_pad = params["w2"].shape[1]     # 128 (>= class_count)

    # Channel-last flatten: index = (i*W + j)*C_IN + c. Raw bytes only, no im2col.
    x_flat = jnp.transpose(x_nchw, (0, 2, 3, 1)).reshape(B, kin)
    x_flat = x_flat.astype(params["wconv"].dtype)

    tb = min(TB_MAX, _round_up(B, 8))
    b_pad = _round_up(B, tb)
    if b_pad != B:
        x_flat = jnp.pad(x_flat, ((0, b_pad - B), (0, 0)))

    out = pl.pallas_call(
        functools.partial(_clf_kernel, approx_recip=approx_recip),
        out_shape=jax.ShapeDtypeStruct((b_pad, ncls_pad), jnp.float32),
        grid=(b_pad // tb,),
        in_specs=[
            pl.BlockSpec((tb, kin), lambda b: (b, 0)),            # x (batch tile)
            pl.BlockSpec((kin, kmid), lambda b: (0, 0)),          # folded conv matrix
            pl.BlockSpec((1, C_MID), lambda b: (0, 0)),           # conv bias
            pl.BlockSpec((C_MID, fc1_pad), lambda b: (0, 0)),     # fc1 (BN folded, padded)
            pl.BlockSpec((1, fc1_pad), lambda b: (0, 0)),         # fc1 bias (padded)
            pl.BlockSpec((fc1_pad, ncls_pad), lambda b: (0, 0)),  # fc2 (padded)
            pl.BlockSpec((1, ncls_pad), lambda b: (0, 0)),        # fc2 bias (pad = -1e9)
        ],
        out_specs=pl.BlockSpec((tb, ncls_pad), lambda b: (b, 0)),
        compiler_params=pltpu.CompilerParams(
            dimension_semantics=("parallel",)),
    )(x_flat, params["wconv"], params["bconv"], params["w1"],
      params["b1"], params["w2"], params["b2"])

    return out[:B, :class_count]


def init_raw_params(key, class_count):
    ks = jax.random.split(key, 10)
    return {
        "wconv_pt": 0.05 * jax.random.normal(ks[0], (C_MID, C_IN, K, K), jnp.float32),
        "bconv":    0.05 * jax.random.normal(ks[1], (C_MID,), jnp.float32),
        "gamma":    1.0 + 0.1 * jax.random.normal(ks[2], (C_MID,), jnp.float32),
        "beta":     0.1 * jax.random.normal(ks[3], (C_MID,), jnp.float32),
        "run_mean": 0.1 * jax.random.normal(ks[4], (C_MID,), jnp.float32),
        "run_var":  1.0 + 0.1 * jnp.abs(jax.random.normal(ks[5], (C_MID,), jnp.float32)),
        "w1_pt":    0.1 * jax.random.normal(ks[6], (FC1_OUT, C_MID), jnp.float32),
        "b1":       0.1 * jax.random.normal(ks[7], (FC1_OUT,), jnp.float32),
        "w2_pt":    0.1 * jax.random.normal(ks[8], (class_count, FC1_OUT), jnp.float32),
        "b2":       0.1 * jax.random.normal(ks[9], (class_count,), jnp.float32),
    }


def pack_params(raw, class_count, compute_dtype=jnp.float32):
    """PyTorch-layout params -> kernel layouts (conv folded to a matrix,
    BatchNorm folded into fc1, fc1/fc2 padded to lane-dense 128 columns)."""
    # (576, 288) conv matrix: M[q*64+c, p*32+o] = w[o, c, qi-pi+1, qj-pj+1]
    # when the tap is in bounds, else 0 (== zero padding).
    w = np.asarray(raw["wconv_pt"], np.float32)                    # (32, 64, 3, 3)
    M = np.zeros((NPOS * C_IN, NPOS * C_MID), np.float32)
    for pi in range(H):
        for pj in range(W):
            p = pi * W + pj
            for qi in range(H):
                for qj in range(W):
                    di, dj = qi - pi + 1, qj - pj + 1
                    if 0 <= di < K and 0 <= dj < K:
                        q = qi * W + qj
                        M[q * C_IN:(q + 1) * C_IN,
                          p * C_MID:(p + 1) * C_MID] = w[:, :, di, dj].T

    # Fold eval-mode BatchNorm (affine) into fc1.
    scale = np.asarray(raw["gamma"]) / np.sqrt(np.asarray(raw["run_var"]) + BN_EPS)
    shift = np.asarray(raw["beta"]) - np.asarray(raw["run_mean"]) * scale
    w1 = np.asarray(raw["w1_pt"], np.float32).T                    # (32, 100)
    w1_f = w1 * scale[:, None]
    b1_f = shift @ w1 + np.asarray(raw["b1"], np.float32)

    fc1_pad = _round_up(FC1_OUT, LANE)
    ncls_pad = _round_up(max(class_count, LANE), LANE)

    w1_p = np.zeros((C_MID, fc1_pad), np.float32)
    w1_p[:, :FC1_OUT] = w1_f
    b1_p = np.zeros((1, fc1_pad), np.float32)
    b1_p[0, :FC1_OUT] = b1_f

    w2 = np.asarray(raw["w2_pt"], np.float32).T                    # (100, C)
    w2_p = np.zeros((fc1_pad, ncls_pad), np.float32)
    w2_p[:FC1_OUT, :class_count] = w2
    b2_p = np.full((1, ncls_pad), NEG_BIG, np.float32)
    b2_p[0, :class_count] = np.asarray(raw["b2"], np.float32)

    return {
        "wconv": jnp.asarray(M, compute_dtype),
        "bconv": jnp.asarray(raw["bconv"], jnp.float32).reshape(1, C_MID),
        "w1": jnp.asarray(w1_p, compute_dtype),
        "b1": jnp.asarray(b1_p, jnp.float32),
        "w2": jnp.asarray(w2_p, compute_dtype),
        "b2": jnp.asarray(b2_p, jnp.float32),
    }


def reference_forward(x, raw):
    """Pure-JAX (no Pallas) reference of the PyTorch forward, eval mode."""
    conv = jax.lax.conv_general_dilated(
        x, raw["wconv_pt"], window_strides=(1, 1), padding=((1, 1), (1, 1)),
        dimension_numbers=("NCHW", "OIHW", "NCHW"))
    conv = jnp.maximum(conv + raw["bconv"][None, :, None, None], 0.0)
    pooled = jnp.max(conv, axis=(2, 3))                            # MaxPool2d(3) on 3x3
    h = (pooled - raw["run_mean"]) / jnp.sqrt(raw["run_var"] + BN_EPS) \
        * raw["gamma"] + raw["beta"]
    h1 = jnp.maximum(h @ raw["w1_pt"].T + raw["b1"], 0.0)
    h1 = jax.nn.sigmoid(h1)
    logits = h1 @ raw["w2_pt"].T + raw["b2"]
    return jax.nn.softmax(logits, axis=1)


if __name__ == "__main__":
    class_count = 10
    batch = 2

    key = jax.random.PRNGKey(0)
    kx, kp = jax.random.split(key)
    x = jax.random.normal(kx, (batch, C_IN, H, W), jnp.float32)    # NCHW (2, 64, 3, 3)

    raw = init_raw_params(kp, class_count)
    ref = jax.block_until_ready(reference_forward(x, raw))

    # f32 / exact-reciprocal path: validate against the pure-JAX reference.
    params_f32 = pack_params(raw, class_count, compute_dtype=jnp.float32)
    out = jax.block_until_ready(
        main_clf_forward(x, params_f32, class_count, approx_recip=False))
    assert out.shape == (batch, class_count)
    assert jnp.allclose(jnp.sum(out, axis=1), 1.0, atol=1e-5)
    assert jnp.allclose(out, ref, atol=1e-4, rtol=1e-4), "f32 mismatch vs reference"

    # bf16-operand / approx-reciprocal performance path (looser tolerance).
    params_bf16 = pack_params(raw, class_count, compute_dtype=jnp.bfloat16)
    out_bf = jax.block_until_ready(
        main_clf_forward(x, params_bf16, class_count, approx_recip=True))
    assert out_bf.shape == (batch, class_count)
    assert jnp.allclose(out_bf, ref, atol=5e-2, rtol=5e-2), "bf16 mismatch vs reference"

    print("KERNEL_OK")
</pallas_src>

<mosaic_0001>
module attributes {stable_mosaic.version = 11 : i64} {
  func.func @_clf_kernel(%arg0: i32, %arg1: memref<8x576xf32, #tpu.memory_space<vmem>>, %arg2: memref<576x288xf32, #tpu.memory_space<vmem>>, %arg3: memref<1x32xf32, #tpu.memory_space<vmem>>, %arg4: memref<32x128xf32, #tpu.memory_space<vmem>>, %arg5: memref<1x128xf32, #tpu.memory_space<vmem>>, %arg6: memref<128x128xf32, #tpu.memory_space<vmem>>, %arg7: memref<1x128xf32, #tpu.memory_space<vmem>>, %arg8: memref<8x128xf32, #tpu.memory_space<vmem>>) attributes {dimension_semantics = [#tpu.dimension_semantics<parallel>], iteration_bounds = array<i64: 1>, scalar_prefetch = 0 : i64, scratch_operands = 0 : i64, tpu.core_type = #tpu.core_type<tc>, window_params = [{transform_indices = @transform_0, window_bounds = array<i64: 8, 576>}, {pipeline_mode = #tpu.pipeline_mode<synchronous>, transform_indices = @transform_1, window_bounds = array<i64: 576, 288>}, {pipeline_mode = #tpu.pipeline_mode<synchronous>, transform_indices = @transform_2, window_bounds = array<i64: 1, 32>}, {pipeline_mode = #tpu.pipeline_mode<synchronous>, transform_indices = @transform_3, window_bounds = array<i64: 32, 128>}, {pipeline_mode = #tpu.pipeline_mode<synchronous>, transform_indices = @transform_4, window_bounds = array<i64: 1, 128>}, {pipeline_mode = #tpu.pipeline_mode<synchronous>, transform_indices = @transform_5, window_bounds = array<i64: 128, 128>}, {pipeline_mode = #tpu.pipeline_mode<synchronous>, transform_indices = @transform_6, window_bounds = array<i64: 1, 128>}, {transform_indices = @transform_7, window_bounds = array<i64: 8, 128>}]} {
    %c0 = arith.constant 0 : index
    %c0_0 = arith.constant 0 : index
    %0 = vector.load %arg1[%c0, %c0_0] : memref<8x576xf32, #tpu.memory_space<vmem>>, vector<8x576xf32>
    %c0_1 = arith.constant 0 : index
    %c0_2 = arith.constant 0 : index
    %1 = vector.load %arg2[%c0_1, %c0_2] : memref<576x288xf32, #tpu.memory_space<vmem>>, vector<576x288xf32>
    %cst = arith.constant dense<0.000000e+00> : vector<8x288xf32>
    %2 = tpu.matmul %0, %1, %cst {dimension_numbers = #tpu.dot_dimension_numbers<[1], [0], [0], [1], [0, 0, 1, 1], [], []>} : vector<8x576xf32>, vector<576x288xf32>, vector<8x288xf32> -> vector<8x288xf32>
    %3 = vector.extract_strided_slice %2 {offsets = [0, 0], sizes = [8, 32], strides = [1, 1]} : vector<8x288xf32> to vector<8x32xf32>
    %4 = vector.extract_strided_slice %2 {offsets = [0, 32], sizes = [8, 32], strides = [1, 1]} : vector<8x288xf32> to vector<8x32xf32>
    %5 = arith.maximumf %3, %4 : vector<8x32xf32>
    %6 = vector.extract_strided_slice %2 {offsets = [0, 64], sizes = [8, 32], strides = [1, 1]} : vector<8x288xf32> to vector<8x32xf32>
    %7 = arith.maximumf %5, %6 : vector<8x32xf32>
    %8 = vector.extract_strided_slice %2 {offsets = [0, 96], sizes = [8, 32], strides = [1, 1]} : vector<8x288xf32> to vector<8x32xf32>
    %9 = arith.maximumf %7, %8 : vector<8x32xf32>
    %10 = vector.extract_strided_slice %2 {offsets = [0, 128], sizes = [8, 32], strides = [1, 1]} : vector<8x288xf32> to vector<8x32xf32>
    %11 = arith.maximumf %9, %10 : vector<8x32xf32>
    %12 = vector.extract_strided_slice %2 {offsets = [0, 160], sizes = [8, 32], strides = [1, 1]} : vector<8x288xf32> to vector<8x32xf32>
    %13 = arith.maximumf %11, %12 : vector<8x32xf32>
    %14 = vector.extract_strided_slice %2 {offsets = [0, 192], sizes = [8, 32], strides = [1, 1]} : vector<8x288xf32> to vector<8x32xf32>
    %15 = arith.maximumf %13, %14 : vector<8x32xf32>
    %16 = vector.extract_strided_slice %2 {offsets = [0, 224], sizes = [8, 32], strides = [1, 1]} : vector<8x288xf32> to vector<8x32xf32>
    %17 = arith.maximumf %15, %16 : vector<8x32xf32>
    %18 = vector.extract_strided_slice %2 {offsets = [0, 256], sizes = [8, 32], strides = [1, 1]} : vector<8x288xf32> to vector<8x32xf32>
    %19 = arith.maximumf %17, %18 : vector<8x32xf32>
    %c0_3 = arith.constant 0 : index
    %c0_4 = arith.constant 0 : index
    %20 = vector.load %arg3[%c0_3, %c0_4] : memref<1x32xf32, #tpu.memory_space<vmem>>, vector<1x32xf32>
    %21 = vector.broadcast %20 : vector<1x32xf32> to vector<8x32xf32>
    %22 = arith.addf %19, %21 : vector<8x32xf32>
    %cst_5 = arith.constant 0.000000e+00 : f32
    %23 = vector.broadcast %cst_5 : f32 to vector<8x32xf32>
    %24 = arith.maximumf %22, %23 : vector<8x32xf32>
    %c0_6 = arith.constant 0 : index
    %c0_7 = arith.constant 0 : index
    %25 = vector.load %arg4[%c0_6, %c0_7] : memref<32x128xf32, #tpu.memory_space<vmem>>, vector<32x128xf32>
    %cst_8 = arith.constant dense<0.000000e+00> : vector<8x128xf32>
    %26 = tpu.matmul %24, %25, %cst_8 {dimension_numbers = #tpu.dot_dimension_numbers<[1], [0], [0], [1], [0, 0, 1, 1], [], []>} : vector<8x32xf32>, vector<32x128xf32>, vector<8x128xf32> -> vector<8x128xf32>
    %c0_9 = arith.constant 0 : index
    %c0_10 = arith.constant 0 : index
    %27 = vector.load %arg5[%c0_9, %c0_10] : memref<1x128xf32, #tpu.memory_space<vmem>>, vector<1x128xf32>
    %28 = vector.broadcast %27 : vector<1x128xf32> to vector<8x128xf32>
    %29 = arith.addf %26, %28 : vector<8x128xf32>
    %cst_11 = arith.constant 0.000000e+00 : f32
    %30 = vector.broadcast %cst_11 : f32 to vector<8x128xf32>
    %31 = arith.maximumf %29, %30 : vector<8x128xf32>
    %cst_12 = arith.constant 0.000000e+00 : f32
    %32 = vector.broadcast %cst_12 : f32 to vector<8x128xf32>
    %33 = arith.subf %32, %31 : vector<8x128xf32>
    %34 = math.exp %33 : vector<8x128xf32>
    %cst_13 = arith.constant 1.000000e+00 : f32
    %35 = vector.broadcast %cst_13 : f32 to vector<8x128xf32>
    %36 = arith.addf %35, %34 : vector<8x128xf32>
    %37 = tpu.reciprocal %36 : vector<8x128xf32> -> vector<8x128xf32>
    %c0_14 = arith.constant 0 : index
    %c0_15 = arith.constant 0 : index
    %38 = vector.load %arg6[%c0_14, %c0_15] : memref<128x128xf32, #tpu.memory_space<vmem>>, vector<128x128xf32>
    %cst_16 = arith.constant dense<0.000000e+00> : vector<8x128xf32>
    %39 = tpu.matmul %37, %38, %cst_16 {dimension_numbers = #tpu.dot_dimension_numbers<[1], [0], [0], [1], [0, 0, 1, 1], [], []>} : vector<8x128xf32>, vector<128x128xf32>, vector<8x128xf32> -> vector<8x128xf32>
    %c0_17 = arith.constant 0 : index
    %c0_18 = arith.constant 0 : index
    %40 = vector.load %arg7[%c0_17, %c0_18] : memref<1x128xf32, #tpu.memory_space<vmem>>, vector<1x128xf32>
    %41 = vector.broadcast %40 : vector<1x128xf32> to vector<8x128xf32>
    %42 = arith.addf %39, %41 : vector<8x128xf32>
    %cst_19 = arith.constant dense<0xFF800000> : vector<8xf32>
    %43 = vector.multi_reduction <maximumf>, %42, %cst_19 [1] : vector<8x128xf32> to vector<8xf32>
    %44 = vector.shape_cast %43 : vector<8xf32> to vector<8x1xf32>
    %45 = vector.broadcast %44 : vector<8x1xf32> to vector<8x128xf32>
    %46 = arith.subf %42, %45 : vector<8x128xf32>
    %47 = math.exp %46 : vector<8x128xf32>
    %cst_20 = arith.constant dense<0.000000e+00> : vector<8xf32>
    %48 = vector.multi_reduction <add>, %47, %cst_20 [1] : vector<8x128xf32> to vector<8xf32>
    %49 = vector.shape_cast %48 : vector<8xf32> to vector<8x1xf32>
    %50 = tpu.reciprocal %49 : vector<8x1xf32> -> vector<8x1xf32>
    %51 = vector.broadcast %50 : vector<8x1xf32> to vector<8x128xf32>
    %52 = arith.mulf %47, %51 : vector<8x128xf32>
    %c0_21 = arith.constant 0 : index
    %c0_22 = arith.constant 0 : index
    %53 = vector.load %arg8[%c0_21, %c0_22] : memref<8x128xf32, #tpu.memory_space<vmem>>, vector<8x128xf32>
    tpu.vector_store %arg8[%c0_21, %c0_22], %52 {strides = array<i32>} : memref<8x128xf32, #tpu.memory_space<vmem>>, vector<8x128xf32>,
    return
  }
  func.func @transform_0(%arg0: i32) -> (i32, i32) {
    %c0_i32 = arith.constant 0 : i32
    %c0_i32_0 = arith.constant 0 : i32
    return %arg0, %c0_i32 : i32, i32
  }
  func.func @transform_1(%arg0: i32) -> (i32, i32) {
    %c0_i32 = arith.constant 0 : i32
    %c0_i32_0 = arith.constant 0 : i32
    %c0_i32_1 = arith.constant 0 : i32
    return %c0_i32, %c0_i32_0 : i32, i32
  }
  func.func @transform_2(%arg0: i32) -> (i32, i32) {
    %c0_i32 = arith.constant 0 : i32
    %c0_i32_0 = arith.constant 0 : i32
    %c0_i32_1 = arith.constant 0 : i32
    return %c0_i32, %c0_i32_0 : i32, i32
  }
  func.func @transform_3(%arg0: i32) -> (i32, i32) {
    %c0_i32 = arith.constant 0 : i32
    %c0_i32_0 = arith.constant 0 : i32
    %c0_i32_1 = arith.constant 0 : i32
    return %c0_i32, %c0_i32_0 : i32, i32
  }
  func.func @transform_4(%arg0: i32) -> (i32, i32) {
    %c0_i32 = arith.constant 0 : i32
    %c0_i32_0 = arith.constant 0 : i32
    %c0_i32_1 = arith.constant 0 : i32
    return %c0_i32, %c0_i32_0 : i32, i32
  }
  func.func @transform_5(%arg0: i32) -> (i32, i32) {
    %c0_i32 = arith.constant 0 : i32
    %c0_i32_0 = arith.constant 0 : i32
    %c0_i32_1 = arith.constant 0 : i32
    return %c0_i32, %c0_i32_0 : i32, i32
  }
  func.func @transform_6(%arg0: i32) -> (i32, i32) {
    %c0_i32 = arith.constant 0 : i32
    %c0_i32_0 = arith.constant 0 : i32
    %c0_i32_1 = arith.constant 0 : i32
    return %c0_i32, %c0_i32_0 : i32, i32
  }
  func.func @transform_7(%arg0: i32) -> (i32, i32) {
    %c0_i32 = arith.constant 0 : i32
    %c0_i32_0 = arith.constant 0 : i32
    return %arg0, %c0_i32 : i32, i32
  }
}

</mosaic_0001>

<bundles_post_ra>
// kernel: tpu_custom_call.1
= control target key start
LH: loop header
LB: loop body
LE: loop exit
PB: predicated region body
PF: predicated region fallthrough
CT: control target
= control target key end

     0   :  { %v1385_v7 = vmov 0.0   ;;  %vm248_vm0 = vcmask 523264   ;;  %s2215_s0 = inlined_call_operand.vmem [shape: f32[8,576], index: 0, kind: input, shape index: {}]   ;;  %s2216_s1 = inlined_call_operand.vmem [shape: f32[576,288], index: 1, kind: input, shape index: {}]   ;;  %s2217_s2 = inlined_call_operand.vmem [shape: f32[1,32], index: 2, kind: input, shape index: {}]   ;;  %s2218_s3 = inlined_call_operand.vmem [shape: f32[32,128], index: 3, kind: input, shape index: {}]   ;;  %s2219_s4 = inlined_call_operand.vmem [shape: f32[1,128], index: 4, kind: input, shape index: {}]   ;;  %s2220_s5 = inlined_call_operand.vmem [shape: f32[128,128], index: 5, kind: input, shape index: {}]   ;;  %s2221_s6 = inlined_call_operand.vmem [shape: f32[1,128], index: 6, kind: input, shape index: {}]   ;;  %s2222_s7 = inlined_call_operand.hbm [shape: f32[8,128], index: 7, kind: output, shape index: {}]  }
   0x1   :  { %v33_v0 = vld [vmem:[%s2216_s1 + $0x8] sm:$0xff]  ;;  %v36_v1 = vld [vmem:[%s2216_s1 + $0x20] sm:$0xff]  ;;  %v35_v4 = vld [vmem:[%s2216_s1 + $0x18] sm:$0xff]  ;;  %458 = vmatprep.mubr.f32.mxu1 %v1385_v7 }
   0x2   :  { %v32_v2 = vld [vmem:[%s2216_s1] sm:$0xff]  ;;  %v1092_v3 = vpack.c.bf16 %v36_v1, %v33_v0  ;;  %v39_v5 = vld [vmem:[%s2216_s1 + $0x38] sm:$0xff]  ;;  %v42_v6 = vld [vmem:[%s2216_s1 + $0x50] sm:$0xff] }
   0x3   :  { %v1094_v8 = vpack.c.bf16 %v35_v4, %v32_v2  ;;  %v1096_v9 = vpack.c.bf16 %v42_v6, %v39_v5  ;;  %v38_v10 = vld [vmem:[%s2216_s1 + $0x30] sm:$0xff]  ;;  %v41_v11 = vld [vmem:[%s2216_s1 + $0x48] sm:$0xff]  ;;  %v48_v13 = vld [vmem:[%s2216_s1 + $0x80] sm:$0xff] }
   0x4   :  { %v45_v12 = vld [vmem:[%s2216_s1 + $0x68] sm:$0xff]  ;;  %1093 = vmatprep.subr.bf16.mxu0 %v1092_v3  ;;  %v1098_v14 = vpack.c.bf16 %v41_v11, %v38_v10  ;;  %v44_v16 = vld [vmem:[%s2216_s1 + $0x60] sm:$0xff]  ;;  %v47_v17 = vld [vmem:[%s2216_s1 + $0x78] sm:$0xff] }
   0x5   :  { %1095 = vmatpush1.bf16.msra.mxu0 %v1094_v8  ;;  %v1100_v15 = vpack.c.bf16 %v48_v13, %v45_v12  ;;  %v51_v18 = vld [vmem:[%s2216_s1 + $0x98] sm:$0xff]  ;;  %v54_v19 = vld [vmem:[%s2216_s1 + $0xb0] sm:$0xff]  ;;  %v1102_v20 = vpack.c.bf16 %v47_v17, %v44_v16  ;;  %v53_v23 = vld [vmem:[%s2216_s1 + $0xa8] sm:$0xff] }
   0x6   :  { %1097 = vmatprep.subr.bf16.mxu0 %v1096_v9  ;;  %v1104_v21 = vpack.c.bf16 %v54_v19, %v51_v18  ;;  %v50_v22 = vld [vmem:[%s2216_s1 + $0x90] sm:$0xff]  ;;  %v57_v24 = vld [vmem:[%s2216_s1 + $0xc8] sm:$0xff]  ;;  %v60_v25 = vld [vmem:[%s2216_s1 + $0xe0] sm:$0xff] }
   0x7   :  { %v1106_v26 = vpack.c.bf16 %v53_v23, %v50_v22  ;;  %v1108_v27 = vpack.c.bf16 %v60_v25, %v57_v24  ;;  %v56_v28 = vld [vmem:[%s2216_s1 + $0xc0] sm:$0xff]  ;;  %v59_v29 = vld [vmem:[%s2216_s1 + $0xd8] sm:$0xff]  ;;  %v66_v31 = vld [vmem:[%s2216_s1 + $0x110] sm:$0xff] }
   0x8   :  { %v63_v30 = vld [vmem:[%s2216_s1 + $0xf8] sm:$0xff]  ;;  %v1110_v32 = vpack.c.bf16 %v59_v29, %v56_v28  ;;  %v62_v34 = vld [vmem:[%s2216_s1 + $0xf0] sm:$0xff]  ;;  %v65_v35 = vld [vmem:[%s2216_s1 + $0x108] sm:$0xff] }
   0x9   :  { %1099 = vmatpush1.bf16.msra.mxu0 %v1098_v14  ;;  %v1112_v33 = vpack.c.bf16 %v66_v31, %v63_v30  ;;  %v69_v36 = vld [vmem:[%s2216_s1 + $0x128] sm:$0xff]  ;;  %v72_v37 = vld [vmem:[%s2216_s1 + $0x140] sm:$0xff]  ;;  %v1114_v38 = vpack.c.bf16 %v65_v35, %v62_v34  ;;  %v71_v41 = vld [vmem:[%s2216_s1 + $0x138] sm:$0xff] }
   0xa   :  { %1101 = vmatprep.subr.bf16.mxu0 %v1100_v15  ;;  %v1116_v39 = vpack.c.bf16 %v72_v37, %v69_v36  ;;  %v68_v40 = vld [vmem:[%s2216_s1 + $0x120] sm:$0xff]  ;;  %v1520_v42 = vld [vmem:[%s2215_s0 + $0x8] sm:$0xff]  ;;  %v75_v43 = vld [vmem:[%s2216_s1 + $0x158] sm:$0xff] }
   0xb   :  { %v78_v44 = vld [vmem:[%s2216_s1 + $0x170] sm:$0xff]  ;;  %316 = vmatprep.mubr.f32.mxu0 %v1520_v42  ;;  %v1118_v45 = vpack.c.bf16 %v71_v41, %v68_v40  ;;  %v77_v48 = vld [vmem:[%s2216_s1 + $0x168] sm:$0xff]  ;;  %v84_v50 = vld [vmem:[%s2216_s1 + $0x1a0] sm:$0xff] }
   0xc   :  { %v1120_v46 = vpack.c.bf16 %v78_v44, %v75_v43  ;;  %v74_v47 = vld [vmem:[%s2216_s1 + $0x150] sm:$0xff]  ;;  %v81_v49 = vld [vmem:[%s2216_s1 + $0x188] sm:$0xff]  ;;  %v80_v53 = vld [vmem:[%s2216_s1 + $0x180] sm:$0xff] }
   0xd   :  { %1103 = vmatpush1.bf16.msra.mxu0 %v1102_v20  ;;  %v1122_v51 = vpack.c.bf16 %v77_v48, %v74_v47  ;;  %v1124_v52 = vpack.c.bf16 %v84_v50, %v81_v49  ;;  %v83_v54 = vld [vmem:[%s2216_s1 + $0x198] sm:$0xff]  ;;  %v90_v56 = vld [vmem:[%s2216_s1 + $0x1d0] sm:$0xff]  ;;  %v89_v60 = vld [vmem:[%s2216_s1 + $0x1c8] sm:$0xff] }
   0xe   :  { %1105 = vmatprep.subr.bf16.mxu0 %v1104_v21  ;;  %v87_v55 = vld [vmem:[%s2216_s1 + $0x1b8] sm:$0xff]  ;;  %v1126_v57 = vpack.c.bf16 %v83_v54, %v80_v53  ;;  %v86_v59 = vld [vmem:[%s2216_s1 + $0x1b0] sm:$0xff]  ;;  %v93_v61 = vld [vmem:[%s2216_s1 + $0x1e8] sm:$0xff] }
   0xf   :  { %v1128_v58 = vpack.c.bf16 %v90_v56, %v87_v55  ;;  %v96_v62 = vld [vmem:[%s2216_s1 + $0x200] sm:$0xff]  ;;  %v1130_v63 = vpack.c.bf16 %v89_v60, %v86_v59  ;;  %v95_v2 = vld [vmem:[%s2216_s1 + $0x1f8] sm:$0xff]  ;;  %v102_v4 = vld [vmem:[%s2216_s1 + $0x230] sm:$0xff] }
  0x10   :  { %v1132_v0 = vpack.c.bf16 %v96_v62, %v93_v61  ;;  %v92_v1 = vld [vmem:[%s2216_s1 + $0x1e0] sm:$0xff]  ;;  %v99_v3 = vld [vmem:[%s2216_s1 + $0x218] sm:$0xff]  ;;  %v225_v5 = vld [vmem:[%s2216_s1 + $0x608] sm:$0xff] }
  0x11   :  { %1107 = vmatpush1.bf16.msra.mxu0 %v1106_v26  ;;  %v228_v6 = vld [vmem:[%s2216_s1 + $0x620] sm:$0xff]  ;;  %v227_v10 = vld [vmem:[%s2216_s1 + $0x618] sm:$0xff]  ;;  %v1134_v11 = vpack.c.bf16 %v95_v2, %v92_v1  ;;  %v98_v12 = vld [vmem:[%s2216_s1 + $0x210] sm:$0xff]  ;;  %v1136_v15 = vpack.c.bf16 %v102_v4, %v99_v3 }
  0x12   :  { %1109 = vmatprep.subr.bf16.mxu0 %v1108_v27  ;;  %v1220_v8 = vpack.c.bf16 %v228_v6, %v225_v5  ;;  %v224_v9 = vld [vmem:[%s2216_s1 + $0x600] sm:$0xff]  ;;  %v231_v14 = vld [vmem:[%s2216_s1 + $0x638] sm:$0xff]  ;;  %v101_v16 = vld [vmem:[%s2216_s1 + $0x228] sm:$0xff] }
  0x13   :  { %v1222_v13 = vpack.c.bf16 %v227_v10, %v224_v9  ;;  %v105_v17 = vld [vmem:[%s2216_s1 + $0x248] sm:$0xff]  ;;  %v234_v18 = vld [vmem:[%s2216_s1 + $0x650] sm:$0xff]  ;;  %v108_v19 = vld [vmem:[%s2216_s1 + $0x260] sm:$0xff]  ;;  %v1138_v26 = vpack.c.bf16 %v101_v16, %v98_v12 }
  0x14   :  { %1221 = vmatprep.subr.bf16.mxu1 %v1220_v8  ;;  %v1224_v20 = vpack.c.bf16 %v234_v18, %v231_v14  ;;  %v230_v21 = vld [vmem:[%s2216_s1 + $0x630] sm:$0xff]  ;;  %v233_v22 = vld [vmem:[%s2216_s1 + $0x648] sm:$0xff]  ;;  %v240_v25 = vld [vmem:[%s2216_s1 + $0x680] sm:$0xff]  ;;  %v1140_v30 = vpack.c.bf16 %v108_v19, %v105_v17 }
  0x15   :  { %1111 = vmatpush1.bf16.msra.mxu0 %v1110_v32  ;;  %1223 = vmatpush1.bf16.msra.mxu1 %v1222_v13  ;;  %v1226_v23 = vpack.c.bf16 %v233_v22, %v230_v21  ;;  %v237_v24 = vld [vmem:[%s2216_s1 + $0x668] sm:$0xff]  ;;  %v104_v27 = vld [vmem:[%s2216_s1 + $0x240] sm:$0xff]  ;;  %v107_v31 = vld [vmem:[%s2216_s1 + $0x258] sm:$0xff] }
  0x16   :  { %1113 = vmatprep.subr.bf16.mxu0 %v1112_v33  ;;  %1225 = vmatprep.subr.bf16.mxu1 %v1224_v20  ;;  %v1228_v28 = vpack.c.bf16 %v240_v25, %v237_v24  ;;  %v236_v29 = vld [vmem:[%s2216_s1 + $0x660] sm:$0xff]  ;;  %v111_v32 = vld [vmem:[%s2216_s1 + $0x278] sm:$0xff]  ;;  %v114_v34 = vld [vmem:[%s2216_s1 + $0x290] sm:$0xff]  ;;  %v1142_v41 = vpack.c.bf16 %v107_v31, %v104_v27 }
  0x17   :  { %v239_v33 = vld [vmem:[%s2216_s1 + $0x678] sm:$0xff]  ;;  %v246_v37 = vld [vmem:[%s2216_s1 + $0x6b0] sm:$0xff]  ;;  %v245_v40 = vld [vmem:[%s2216_s1 + $0x6a8] sm:$0xff]  ;;  %v1144_v43 = vpack.c.bf16 %v114_v34, %v111_v32 }
  0x18   :  { %v1230_v35 = vpack.c.bf16 %v239_v33, %v236_v29  ;;  %v243_v36 = vld [vmem:[%s2216_s1 + $0x698] sm:$0xff]  ;;  %v110_v44 = vld [vmem:[%s2216_s1 + $0x270] sm:$0xff]  ;;  %v117_v47 = vld [vmem:[%s2216_s1 + $0x2a8] sm:$0xff] }
  0x19   :  { %1115 = vmatpush1.bf16.msra.mxu0 %v1114_v38  ;;  %1227 = vmatpush1.bf16.msra.mxu1 %v1226_v23  ;;  %v1232_v38 = vpack.c.bf16 %v246_v37, %v243_v36  ;;  %v120_v48 = vld [vmem:[%s2216_s1 + $0x2c0] sm:$0xff]  ;;  %v85_v50 = vld [vmem:[%s2216_s1 + $0x1a8] sm:$0xff]  ;;  %v91_v56 = vld [vmem:[%s2216_s1 + $0x1d8] sm:$0xff] }
  0x1a   :  { %1117 = vmatprep.subr.bf16.mxu0 %v1116_v39  ;;  %1229 = vmatprep.subr.bf16.mxu1 %v1228_v28  ;;  %v242_v39 = vld [vmem:[%s2216_s1 + $0x690] sm:$0xff]  ;;  %v37_v53 = vld [vmem:[%s2216_s1 + $0x28] sm:$0xff]  ;;  %v88_v55 = vld [vmem:[%s2216_s1 + $0x1c0] sm:$0xff] }
  0x1b   :  { %v1234_v49 = vpack.c.bf16 %v245_v40, %v242_v39  ;;  %v119_v59 = vld [vmem:[%s2216_s1 + $0x2b8] sm:$0xff]  ;;  %v126_v61 = vld [vmem:[%s2216_s1 + $0x2f0] sm:$0xff]  ;;  %v1694_v62 = vld [vmem:[%s2215_s0 + $0x20] sm:$0xff] }
  0x1c   :  { %v123_v60 = vld [vmem:[%s2216_s1 + $0x2d8] sm:$0xff]  ;;  %v40_v1 = vld [vmem:[%s2216_s1 + $0x40] sm:$0xff]  ;;  %v94_v4 = vld [vmem:[%s2216_s1 + $0x1f0] sm:$0xff] }
  0x1d   :  { %1119 = vmatpush1.bf16.msra.mxu0 %v1118_v45  ;;  %v113_v45 = vld [vmem:[%s2216_s1 + $0x288] sm:$0xff]  ;;  %1231 = vmatpush1.bf16.msra.mxu1 %v1230_v35  ;;  %v43_v2 = vld [vmem:[%s2216_s1 + $0x58] sm:$0xff]  ;;  %v1152_v6 = vpack.c.bf16 %v126_v61, %v123_v60  ;;  %v122_v8 = vld [vmem:[%s2216_s1 + $0x2d0] sm:$0xff] }
  0x1e   :  { %1121 = vmatprep.subr.bf16.mxu0 %v1120_v46  ;;  %v82_v46 = vld [vmem:[%s2216_s1 + $0x190] sm:$0xff]  ;;  %1233 = vmatprep.subr.bf16.mxu1 %v1232_v38  ;;  %v1146_v54 = vpack.c.bf16 %v113_v45, %v110_v44  ;;  %v97_v5 = vld [vmem:[%s2216_s1 + $0x208] sm:$0xff]  ;;  %v1242_v12 = vpack.c.bf16 %v43_v2, %v40_v1  ;;  %v100_v17 = vld [vmem:[%s2216_s1 + $0x220] sm:$0xff] }
  0x1f   :  { %v125_v9 = vld [vmem:[%s2216_s1 + $0x2e8] sm:$0xff]  ;;  %v1244_v13 = vpack.c.bf16 %v97_v5, %v94_v4  ;;  %v46_v14 = vld [vmem:[%s2216_s1 + $0x70] sm:$0xff]  ;;  %v128_v19 = vld [vmem:[%s2216_s1 + $0x300] sm:$0xff] }
  0x20   :  { %v129_v10 = vld [vmem:[%s2216_s1 + $0x308] sm:$0xff]  ;;  %v1154_v16 = vpack.c.bf16 %v125_v9, %v122_v8  ;;  %v131_v20 = vld [vmem:[%s2216_s1 + $0x318] sm:$0xff]  ;;  %v138_v22 = vld [vmem:[%s2216_s1 + $0x350] sm:$0xff] }
  0x21   :  { %1123 = vmatpush1.bf16.msra.mxu0 %v1122_v51  ;;  %v1236_v51 = vpack.c.bf16 %v85_v50, %v82_v46  ;;  %1235 = vmatpush1.bf16.msra.mxu1 %v1234_v49  ;;  %v135_v21 = vld [vmem:[%s2216_s1 + $0x338] sm:$0xff]  ;;  %v52_v25 = vld [vmem:[%s2216_s1 + $0xa0] sm:$0xff]  ;;  %v1158_v28 = vpack.c.bf16 %v131_v20, %v128_v19  ;;  %v106_v29 = vld [vmem:[%s2216_s1 + $0x250] sm:$0xff] }
  0x22   :  { %1125 = vmatprep.subr.bf16.mxu0 %v1124_v52  ;;  %v34_v52 = vld [vmem:[%s2216_s1 + $0x10] sm:$0xff]  ;;  %v1756_v27 = vld [vmem:[%s2215_s0] sm:$0xff]  ;;  %v1160_v31 = vpack.c.bf16 %v138_v22, %v135_v21  ;;  %v137_v33 = vld [vmem:[%s2216_s1 + $0x348] sm:$0xff] }
  0x23   :  { %1237 = vmatprep.subr.bf16.mxu1 %v1236_v51  ;;  %v134_v32 = vld [vmem:[%s2216_s1 + $0x330] sm:$0xff]  ;;  %v1773_v34 = vld [vmem:[%s2215_s0 + $0x18] sm:$0xff]  ;;  %v141_v35 = vld [vmem:[%s2216_s1 + $0x368] sm:$0xff] }
  0x24   :  { %920 = vmatmul.mubr.msk.f32.vlgmr.msra.gmra.mrb[0].mxu1 %vm248_vm0, %v1694_v62  ;;  %v144_v36 = vld [vmem:[%s2216_s1 + $0x380] sm:$0xff]  ;;  %v58_v39 = vld [vmem:[%s2216_s1 + $0xd0] sm:$0xff]  ;;  %v61_v40 = vld [vmem:[%s2216_s1 + $0xe8] sm:$0xff] }
  0x25   :  { %1127 = vmatpush1.bf16.msra.mxu0 %v1126_v57  ;;  %v1148_v57 = vpack.c.bf16 %v120_v48, %v117_v47  ;;  %529 = vmatprep.mubr.f32.mxu1 %v1520_v42  ;;  %v103_v42 = vld [vmem:[%s2216_s1 + $0x238] sm:$0xff]  ;;  %v1164_v45 = vpack.c.bf16 %v144_v36, %v141_v35  ;;  %v140_v46 = vld [vmem:[%s2216_s1 + $0x360] sm:$0xff]  ;;  %v150_v49 = vld [vmem:[%s2216_s1 + $0x3b0] sm:$0xff]  ;;  %v1254_v50 = vpack.c.bf16 %v61_v40, %v58_v39 }
  0x26   :  { %1129 = vmatprep.subr.bf16.mxu0 %v1128_v58  ;;  %v116_v58 = vld [vmem:[%s2216_s1 + $0x2a0] sm:$0xff]  ;;  %v1248_v24 = vpack.c.bf16 %v103_v42, %v100_v17  ;;  %v115_v44 = vld [vmem:[%s2216_s1 + $0x298] sm:$0xff] }
  0x27   :  { %v1150_v3 = vpack.c.bf16 %v119_v59, %v116_v58  ;;  %v143_v47 = vld [vmem:[%s2216_s1 + $0x378] sm:$0xff]  ;;  %v146_v58 = vld [vmem:[%s2216_s1 + $0x390] sm:$0xff]  ;;  %v149_v59 = vld [vmem:[%s2216_s1 + $0x3a8] sm:$0xff] }
  0x28   :  { %v147_v48 = vld [vmem:[%s2216_s1 + $0x398] sm:$0xff] }
  0x29   :  { %1131 = vmatpush1.bf16.msra.mxu0 %v1130_v63  ;;  %v1238_v63 = vpack.c.bf16 %v37_v53, %v34_v52  ;;  %v64_v52 = vld [vmem:[%s2216_s1 + $0x100] sm:$0xff]  ;;  %v67_v53 = vld [vmem:[%s2216_s1 + $0x118] sm:$0xff] }
  0x2a   :  { %1133 = vmatprep.subr.bf16.mxu0 %v1132_v0  ;;  %v1240_v0 = vpack.c.bf16 %v91_v56, %v88_v55  ;;  %v118_v55 = vld [vmem:[%s2216_s1 + $0x2b0] sm:$0xff]  ;;  %v121_v56 = vld [vmem:[%s2216_s1 + $0x2c8] sm:$0xff] }
  0x2b   :  { %1239 = vmatpush3.bf16.msra.mxu1 %v1238_v63 }
  0x2c   :  { %1241 = vmatprep.subr.bf16.mxu1 %v1240_v0 }
  0x2d   :  { %1135 = vmatpush1.bf16.msra.mxu0 %v1134_v11  ;;  %v132_v11 = vld [vmem:[%s2216_s1 + $0x320] sm:$0xff] }
  0x2e   :  { %1137 = vmatprep.subr.bf16.mxu0 %v1136_v15  ;;  %v49_v15 = vld [vmem:[%s2216_s1 + $0x88] sm:$0xff]  ;;  %v1156_v18 = vpack.c.bf16 %v132_v11, %v129_v10 }
  0x2f   :  { %1243 = vmatpush3.bf16.msra.mxu1 %v1242_v12  ;;  %v1246_v23 = vpack.c.bf16 %v49_v15, %v46_v14 }
  0x30   :  { %1245 = vmatprep.subr.bf16.mxu1 %v1244_v13 }
  0x31   :  { %1139 = vmatpush1.bf16.msra.mxu0 %v1138_v26  ;;  %v55_v26 = vld [vmem:[%s2216_s1 + $0xb8] sm:$0xff] }
  0x32   :  { %1141 = vmatprep.subr.bf16.mxu0 %v1140_v30  ;;  %v109_v30 = vld [vmem:[%s2216_s1 + $0x268] sm:$0xff]  ;;  %v1250_v37 = vpack.c.bf16 %v55_v26, %v52_v25 }
  0x33   :  { %1247 = vmatpush3.bf16.msra.mxu1 %v1246_v23  ;;  %v1252_v38 = vpack.c.bf16 %v109_v30, %v106_v29 }
  0x34   :  { %1249 = vmatprep.subr.bf16.mxu1 %v1248_v24 }
  0x35   :  { %1143 = vmatpush1.bf16.msra.mxu0 %v1142_v41  ;;  %v1162_v41 = vpack.c.bf16 %v137_v33, %v134_v32 }
  0x36   :  { %1145 = vmatprep.subr.bf16.mxu0 %v1144_v43  ;;  %v112_v43 = vld [vmem:[%s2216_s1 + $0x280] sm:$0xff] }
  0x37   :  { %1251 = vmatpush3.bf16.msra.mxu1 %v1250_v37  ;;  %v1256_v51 = vpack.c.bf16 %v115_v44, %v112_v43 }
  0x38   :  { %1253 = vmatprep.subr.bf16.mxu1 %v1252_v38 }
  0x39   :  { %1147 = vmatpush1.bf16.msra.mxu0 %v1146_v54  ;;  %v1166_v54 = vpack.c.bf16 %v143_v47, %v140_v46 }
  0x3a   :  { %1149 = vmatprep.subr.bf16.mxu0 %v1148_v57  ;;  %v1168_v57 = vpack.c.bf16 %v150_v49, %v147_v48 }
  0x3d   :  { %1151 = vmatpush1.bf16.msra.mxu0 %v1150_v3 }
  0x3e   :  { %1153 = vmatprep.subr.bf16.mxu0 %v1152_v6 }
  0x41   :  { %1155 = vmatpush1.bf16.msra.mxu0 %v1154_v16 }
  0x42   :  { %1157 = vmatprep.subr.bf16.mxu0 %v1156_v18 }
  0x44   :  { %317 = vmatmul.mubr.f32.vlgmr.msra.gmra.mrb[0].mxu0 %v1756_v27 }
  0x45   :  { %1159 = vmatpush1.bf16.msra.mxu0 %v1158_v28  ;;  %387 = vmatprep.mubr.f32.mxu0 %v1773_v34 }
  0x46   :  { %1161 = vmatprep.subr.bf16.mxu0 %v1160_v31 }
  0x49   :  { %1163 = vmatpush1.bf16.msra.mxu0 %v1162_v41 }
  0x4a   :  { %1165 = vmatprep.subr.bf16.mxu0 %v1164_v45 }
  0x4b   :  { %12 = vsyncpa [#allocation3], 0  ;;  %v153_v60 = vld [vmem:[%s2216_s1 + $0x3c8] sm:$0xff]  ;;  %v156_v61 = vld [vmem:[%s2216_s1 + $0x3e0] sm:$0xff]  ;;  %1255 = vmatpush3.bf16.msra.mxu1 %v1254_v50  ;;  %v1258_v63 = vpack.c.bf16 %v67_v53, %v64_v52  ;;  %v1260_v0 = vpack.c.bf16 %v121_v56, %v118_v55  ;;  %v1170_v3 = vpack.c.bf16 %v149_v59, %v146_v58  ;;  %vm1387_vm1 = vmmov 0   ;;  %s1388_s8 = smov 32  }
  0x4c   :  { %1257 = vmatprep.subr.bf16.mxu1 %v1256_v51  ;;  %v70_v1 = vld [vmem:[%s2216_s1 + $0x130] sm:$0xff]  ;;  %v73_v2 = vld [vmem:[%s2216_s1 + $0x148] sm:$0xff]  ;;  %v124_v4 = vld [vmem:[%s2216_s1 + $0x2e0] sm:$0xff]  ;;  %v1172_v6 = vpack.c.bf16 %v156_v61, %v153_v60  ;;  %s1389_s9 = smov 96   ;;  %s1390_s14 = smov 64   ;;  %vm723_vm2 = vcmask 261120  }
  0x4d   :  { %1167 = vmatpush1.bf16.msra.mxu0 %v1166_v54  ;;  %v127_v5 = vld [vmem:[%s2216_s1 + $0x2f8] sm:$0xff]  ;;  %v152_v8 = vld [vmem:[%s2216_s1 + $0x3c0] sm:$0xff]  ;;  %v162_v11 = vld [vmem:[%s2216_s1 + $0x410] sm:$0xff]  ;;  %v1262_v12 = vpack.c.bf16 %v73_v2, %v70_v1 }
  0x4e   :  { %1169 = vmatprep.subr.bf16.mxu0 %v1168_v57  ;;  %v155_v9 = vld [vmem:[%s2216_s1 + $0x3d8] sm:$0xff]  ;;  %v1264_v13 = vpack.c.bf16 %v127_v5, %v124_v4  ;;  %v76_v14 = vld [vmem:[%s2216_s1 + $0x160] sm:$0xff]  ;;  %v178_v17 = vld [vmem:[%s2216_s1 + $0x490] sm:$0xff] }
  0x4f   :  { %v159_v10 = vld [vmem:[%s2216_s1 + $0x3f8] sm:$0xff]  ;;  %1259 = vmatpush3.bf16.msra.mxu1 %v1258_v63  ;;  %v1174_v16 = vpack.c.bf16 %v155_v9, %v152_v8  ;;  %v181_v42 = vld [vmem:[%s2216_s1 + $0x4a8] sm:$0xff]  ;;  %v158_v19 = vld [vmem:[%s2216_s1 + $0x3f0] sm:$0xff] }
  0x50   :  { %1261 = vmatprep.subr.bf16.mxu1 %v1260_v0  ;;  %v79_v15 = vld [vmem:[%s2216_s1 + $0x178] sm:$0xff]  ;;  %v1176_v18 = vpack.c.bf16 %v162_v11, %v159_v10  ;;  %v161_v20 = vld [vmem:[%s2216_s1 + $0x408] sm:$0xff]  ;;  %v168_v22 = vld [vmem:[%s2216_s1 + $0x440] sm:$0xff]  ;;  %v1268_v24 = vpack.c.bf16 %v181_v42, %v178_v17 }
  0x51   :  { %1171 = vmatpush1.bf16.msra.mxu0 %v1170_v3  ;;  %v165_v21 = vld [vmem:[%s2216_s1 + $0x428] sm:$0xff]  ;;  %v1266_v23 = vpack.c.bf16 %v79_v15, %v76_v14  ;;  %v130_v25 = vld [vmem:[%s2216_s1 + $0x310] sm:$0xff]  ;;  %v1178_v28 = vpack.c.bf16 %v161_v20, %v158_v19  ;;  %v184_v29 = vld [vmem:[%s2216_s1 + $0x4c0] sm:$0xff] }
  0x52   :  { %1173 = vmatprep.subr.bf16.mxu0 %v1172_v6  ;;  %v133_v26 = vld [vmem:[%s2216_s1 + $0x328] sm:$0xff]  ;;  %v187_v30 = vld [vmem:[%s2216_s1 + $0x4d8] sm:$0xff]  ;;  %v1180_v31 = vpack.c.bf16 %v168_v22, %v165_v21  ;;  %v164_v32 = vld [vmem:[%s2216_s1 + $0x420] sm:$0xff] }
  0x53   :  { %1263 = vmatpush3.bf16.msra.mxu1 %v1262_v12  ;;  %v167_v33 = vld [vmem:[%s2216_s1 + $0x438] sm:$0xff]  ;;  %v174_v36 = vld [vmem:[%s2216_s1 + $0x470] sm:$0xff]  ;;  %v1270_v37 = vpack.c.bf16 %v133_v26, %v130_v25  ;;  %v1272_v38 = vpack.c.bf16 %v187_v30, %v184_v29  ;;  %v136_v39 = vld [vmem:[%s2216_s1 + $0x340] sm:$0xff] }
  0x54   :  { %1265 = vmatprep.subr.bf16.mxu1 %v1264_v13  ;;  %v171_v35 = vld [vmem:[%s2216_s1 + $0x458] sm:$0xff]  ;;  %v1182_v41 = vpack.c.bf16 %v167_v33, %v164_v32  ;;  %v190_v43 = vld [vmem:[%s2216_s1 + $0x4f0] sm:$0xff]  ;;  %v193_v44 = vld [vmem:[%s2216_s1 + $0x508] sm:$0xff] }
  0x55   :  { %1175 = vmatpush1.bf16.msra.mxu0 %v1174_v16  ;;  %v139_v40 = vld [vmem:[%s2216_s1 + $0x358] sm:$0xff]  ;;  %v1184_v45 = vpack.c.bf16 %v174_v36, %v171_v35  ;;  %v170_v46 = vld [vmem:[%s2216_s1 + $0x450] sm:$0xff]  ;;  %v173_v47 = vld [vmem:[%s2216_s1 + $0x468] sm:$0xff]  ;;  %v1276_v51 = vpack.c.bf16 %v193_v44, %v190_v43 }
  0x56   :  { %1177 = vmatprep.subr.bf16.mxu0 %v1176_v18  ;;  %v177_v48 = vld [vmem:[%s2216_s1 + $0x488] sm:$0xff]  ;;  %v180_v49 = vld [vmem:[%s2216_s1 + $0x4a0] sm:$0xff]  ;;  %v1274_v50 = vpack.c.bf16 %v139_v40, %v136_v39  ;;  %v142_v52 = vld [vmem:[%s2216_s1 + $0x370] sm:$0xff]  ;;  %v1186_v53 = vpack.c.bf16 %v173_v47, %v170_v46 }
  0x57   :  { %1267 = vmatpush3.bf16.msra.mxu1 %v1266_v23  ;;  %v196_v54 = vld [vmem:[%s2216_s1 + $0x520] sm:$0xff]  ;;  %v1188_v55 = vpack.c.bf16 %v180_v49, %v177_v48  ;;  %v179_v57 = vld [vmem:[%s2216_s1 + $0x498] sm:$0xff]  ;;  %v186_v59 = vld [vmem:[%s2216_s1 + $0x4d0] sm:$0xff] }
  0x58   :  { %1269 = vmatprep.subr.bf16.mxu1 %v1268_v24  ;;  %v176_v56 = vld [vmem:[%s2216_s1 + $0x480] sm:$0xff]  ;;  %v183_v58 = vld [vmem:[%s2216_s1 + $0x4b8] sm:$0xff]  ;;  %v202_v2 = vld [vmem:[%s2216_s1 + $0x550] sm:$0xff] }
  0x59   :  { %1179 = vmatpush1.bf16.msra.mxu0 %v1178_v28  ;;  %v148_v63 = vld [vmem:[%s2216_s1 + $0x3a0] sm:$0xff]  ;;  %v151_v0 = vld [vmem:[%s2216_s1 + $0x3b8] sm:$0xff]  ;;  %v1190_v1 = vpack.c.bf16 %v179_v57, %v176_v56  ;;  %v205_v3 = vld [vmem:[%s2216_s1 + $0x568] sm:$0xff]  ;;  %v1192_v4 = vpack.c.bf16 %v186_v59, %v183_v58 }
  0x5a   :  { %1181 = vmatprep.subr.bf16.mxu0 %v1180_v31  ;;  %530 = vmatmul.mubr.f32.vlgmr.msra.gmra.mrb[2].mxu1 %v1756_v27  ;;  %v145_v27 = vld [vmem:[%s2216_s1 + $0x388] sm:$0xff]  ;;  %v182_v5 = vld [vmem:[%s2216_s1 + $0x4b0] sm:$0xff]  ;;  %v192_v9 = vld [vmem:[%s2216_s1 + $0x500] sm:$0xff]  ;;  %v1282_v10 = vpack.c.bf16 %v151_v0, %v148_v63  ;;  %v1284_v11 = vpack.c.bf16 %v205_v3, %v202_v2  ;;  %v1386_v3 = vmov 0.0|0.0  }
  0x5b   :  { %1271 = vmatpush3.bf16.msra.mxu1 %v1270_v37  ;;  %599 = vmatprep.mubr.f32.mxu1 %v1773_v34  ;;  %v199_v34 = vld [vmem:[%s2216_s1 + $0x538] sm:$0xff]  ;;  %v1278_v60 = vpack.c.bf16 %v145_v27, %v142_v52  ;;  %v185_v6 = vld [vmem:[%s2216_s1 + $0x4c8] sm:$0xff]  ;;  %v154_v12 = vld [vmem:[%s2216_s1 + $0x3d0] sm:$0xff] }
  0x5c   :  { %1273 = vmatprep.subr.bf16.mxu1 %v1272_v38  ;;  %v1280_v61 = vpack.c.bf16 %v199_v34, %v196_v54  ;;  %v189_v8 = vld [vmem:[%s2216_s1 + $0x4e8] sm:$0xff]  ;;  %v1194_v14 = vpack.c.bf16 %v185_v6, %v182_v5  ;;  %v208_v15 = vld [vmem:[%s2216_s1 + $0x580] sm:$0xff]  ;;  %v211_v16 = vld [vmem:[%s2216_s1 + $0x598] sm:$0xff] }
  0x5d   :  { %1183 = vmatpush1.bf16.msra.mxu0 %v1182_v41  ;;  %v157_v13 = vld [vmem:[%s2216_s1 + $0x3e8] sm:$0xff]  ;;  %v1196_v17 = vpack.c.bf16 %v192_v9, %v189_v8  ;;  %v188_v42 = vld [vmem:[%s2216_s1 + $0x4e0] sm:$0xff]  ;;  %v191_v18 = vld [vmem:[%s2216_s1 + $0x4f8] sm:$0xff]  ;;  %v1288_v22 = vpack.c.bf16 %v211_v16, %v208_v15 }
  0x5e   :  { %1185 = vmatprep.subr.bf16.mxu0 %v1184_v45  ;;  %v195_v19 = vld [vmem:[%s2216_s1 + $0x518] sm:$0xff]  ;;  %v198_v20 = vld [vmem:[%s2216_s1 + $0x530] sm:$0xff]  ;;  %v1286_v21 = vpack.c.bf16 %v157_v13, %v154_v12  ;;  %v160_v23 = vld [vmem:[%s2216_s1 + $0x400] sm:$0xff]  ;;  %v1198_v25 = vpack.c.bf16 %v191_v18, %v188_v42 }
  0x5f   :  { %1275 = vmatpush3.bf16.msra.mxu1 %v1274_v50  ;;  %v163_v24 = vld [vmem:[%s2216_s1 + $0x418] sm:$0xff]  ;;  %v214_v26 = vld [vmem:[%s2216_s1 + $0x5b0] sm:$0xff]  ;;  %v217_v28 = vld [vmem:[%s2216_s1 + $0x5c8] sm:$0xff]  ;;  %v1200_v29 = vpack.c.bf16 %v198_v20, %v195_v19 }
  0x60   :  { %1277 = vmatprep.subr.bf16.mxu1 %v1276_v51  ;;  %v194_v30 = vld [vmem:[%s2216_s1 + $0x510] sm:$0xff]  ;;  %v197_v31 = vld [vmem:[%s2216_s1 + $0x528] sm:$0xff]  ;;  %v204_v33 = vld [vmem:[%s2216_s1 + $0x560] sm:$0xff]  ;;  %v1290_v35 = vpack.c.bf16 %v163_v24, %v160_v23  ;;  %v1292_v36 = vpack.c.bf16 %v217_v28, %v214_v26 }
  0x61   :  { %1187 = vmatpush1.bf16.msra.mxu0 %v1186_v53  ;;  %v201_v32 = vld [vmem:[%s2216_s1 + $0x548] sm:$0xff]  ;;  %v166_v37 = vld [vmem:[%s2216_s1 + $0x430] sm:$0xff]  ;;  %v1202_v39 = vpack.c.bf16 %v197_v31, %v194_v30  ;;  %v220_v40 = vld [vmem:[%s2216_s1 + $0x5e0] sm:$0xff] }
  0x62   :  { %1189 = vmatprep.subr.bf16.mxu0 %v1188_v55  ;;  %v169_v38 = vld [vmem:[%s2216_s1 + $0x448] sm:$0xff]  ;;  %v223_v41 = vld [vmem:[%s2216_s1 + $0x5f8] sm:$0xff]  ;;  %v1204_v43 = vpack.c.bf16 %v204_v33, %v201_v32  ;;  %v200_v44 = vld [vmem:[%s2216_s1 + $0x540] sm:$0xff] }
  0x63   :  { %1279 = vmatpush3.bf16.msra.mxu1 %v1278_v60  ;;  %v203_v45 = vld [vmem:[%s2216_s1 + $0x558] sm:$0xff]  ;;  %v210_v47 = vld [vmem:[%s2216_s1 + $0x590] sm:$0xff]  ;;  %v1294_v48 = vpack.c.bf16 %v169_v38, %v166_v37  ;;  %v1296_v49 = vpack.c.bf16 %v223_v41, %v220_v40  ;;  %v172_v50 = vld [vmem:[%s2216_s1 + $0x460] sm:$0xff] }
  0x64   :  { %1281 = vmatprep.subr.bf16.mxu1 %v1280_v61  ;;  %v207_v46 = vld [vmem:[%s2216_s1 + $0x578] sm:$0xff]  ;;  %v1206_v52 = vpack.c.bf16 %v203_v45, %v200_v44  ;;  %v206_v53 = vld [vmem:[%s2216_s1 + $0x570] sm:$0xff]  ;;  %v209_v54 = vld [vmem:[%s2216_s1 + $0x588] sm:$0xff] }
  0x65   :  { %1191 = vmatpush1.bf16.msra.mxu0 %v1190_v1  ;;  %v175_v51 = vld [vmem:[%s2216_s1 + $0x478] sm:$0xff]  ;;  %v1208_v27 = vpack.c.bf16 %v210_v47, %v207_v46  ;;  %v213_v34 = vld [vmem:[%s2216_s1 + $0x5a8] sm:$0xff]  ;;  %v216_v55 = vld [vmem:[%s2216_s1 + $0x5c0] sm:$0xff]  ;;  %v1210_v59 = vpack.c.bf16 %v209_v54, %v206_v53 }
  0x66   :  { %1193 = vmatprep.subr.bf16.mxu0 %v1192_v4  ;;  %v1298_v56 = vpack.c.bf16 %v175_v51, %v172_v50  ;;  %v226_v57 = vld [vmem:[%s2216_s1 + $0x610] sm:$0xff]  ;;  %v229_v58 = vld [vmem:[%s2216_s1 + $0x628] sm:$0xff]  ;;  %v1212_v60 = vpack.c.bf16 %v216_v55, %v213_v34  ;;  %v212_v61 = vld [vmem:[%s2216_s1 + $0x5a0] sm:$0xff] }
  0x67   :  { %1283 = vmatpush3.bf16.msra.mxu1 %v1282_v10  ;;  %v215_v63 = vld [vmem:[%s2216_s1 + $0x5b8] sm:$0xff]  ;;  %v222_v1 = vld [vmem:[%s2216_s1 + $0x5f0] sm:$0xff]  ;;  %v1301_v2 = vpack.c.bf16 %v229_v58, %v226_v57  ;;  %v232_v4 = vld [vmem:[%s2216_s1 + $0x640] sm:$0xff] }
  0x68   :  { %1285 = vmatprep.subr.bf16.mxu1 %v1284_v11  ;;  %v219_v0 = vld [vmem:[%s2216_s1 + $0x5d8] sm:$0xff]  ;;  %v1214_v6 = vpack.c.bf16 %v215_v63, %v212_v61  ;;  %v29_v8 = vld [vmem:[%s2215_s0 + $0x10] sm:$0xff]  ;;  %v221_v11 = vld [vmem:[%s2216_s1 + $0x5e8] sm:$0xff] }
  0x69   :  { %1195 = vmatpush1.bf16.msra.mxu0 %v1194_v14  ;;  %v235_v5 = vld [vmem:[%s2216_s1 + $0x658] sm:$0xff]  ;;  %v1216_v9 = vpack.c.bf16 %v222_v1, %v219_v0  ;;  %v218_v10 = vld [vmem:[%s2216_s1 + $0x5d0] sm:$0xff]  ;;  %v241_v14 = vld [vmem:[%s2216_s1 + $0x688] sm:$0xff] }
  0x6a   :  { %1197 = vmatprep.subr.bf16.mxu0 %v1196_v17  ;;  %v1304_v12 = vpack.c.bf16 %v235_v5, %v232_v4  ;;  %v238_v13 = vld [vmem:[%s2216_s1 + $0x670] sm:$0xff]  ;;  %v1218_v15 = vpack.c.bf16 %v221_v11, %v218_v10  ;;  %v244_v17 = vld [vmem:[%s2216_s1 + $0x6a0] sm:$0xff]  ;;  %v247_v42 = vld [vmem:[%s2216_s1 + $0x6b8] sm:$0xff] }
  0x6b   :  { %1287 = vmatpush3.bf16.msra.mxu1 %v1286_v21  ;;  %v1307_v16 = vpack.c.bf16 %v241_v14, %v238_v13  ;;  %v1310_v18 = vpack.c.bf16 %v247_v42, %v244_v17  ;;  %v713_v33 = vld [vmem:[%s2218_s3 + $0x8] sm:$0xff]  ;;  %v714_v37 = vld [vmem:[%s2218_s3 + $0x10] sm:$0xff]  ;;  %v715_v38 = vld [vmem:[%s2218_s3 + $0x18] sm:$0xff] }
  0x6c   :  { %1289 = vmatprep.subr.bf16.mxu1 %v1288_v22  ;;  %v1316_v41 = vpack.c.bf16 %v715_v38, %v714_v37  ;;  %v922_v34 = vld [vmem:[%s2217_s2] ss:$0 sm:$0xff]  ;;  %v805_v61 = vld [vmem:[%s2220_s5 + $0x10] sm:$0xff]  ;;  %v808_v1 = vld [vmem:[%s2220_s5 + $0x28] sm:$0xff] }
  0x6d   :  { %1199 = vmatpush1.bf16.msra.mxu0 %v1198_v25  ;;  %v803_v58 = vld [vmem:[%s2220_s5] sm:$0xff]  ;;  %v809_v4 = vld [vmem:[%s2220_s5 + $0x30] sm:$0xff]  ;;  %v810_v5 = vld [vmem:[%s2220_s5 + $0x38] sm:$0xff] }
  0x6e   :  { %1201 = vmatprep.subr.bf16.mxu0 %v1200_v29  ;;  %v807_v0 = vld [vmem:[%s2220_s5 + $0x20] sm:$0xff]  ;;  %v813_v11 = vld [vmem:[%s2220_s5 + $0x50] sm:$0xff]  ;;  %v818_v42 = vld [vmem:[%s2220_s5 + $0x78] sm:$0xff] }
  0x6f   :  { %1291 = vmatpush3.bf16.msra.mxu1 %v1290_v35  ;;  %v815_v14 = vld [vmem:[%s2220_s5 + $0x60] sm:$0xff]  ;;  %v817_v17 = vld [vmem:[%s2220_s5 + $0x70] sm:$0xff] }
  0x70   :  { %1293 = vmatprep.subr.bf16.mxu1 %v1292_v36 }
  0x71   :  { %1203 = vmatpush1.bf16.msra.mxu0 %v1202_v39 }
  0x72   :  { %1205 = vmatprep.subr.bf16.mxu0 %v1204_v43 }
  0x73   :  { %1295 = vmatpush3.bf16.msra.mxu1 %v1294_v48 }
  0x74   :  { %1297 = vmatprep.subr.bf16.mxu1 %v1296_v49 }
  0x75   :  { %1207 = vmatpush1.bf16.msra.mxu0 %v1206_v52 }
  0x76   :  { %1209 = vmatprep.subr.bf16.mxu0 %v1208_v27 }
  0x77   :  { %1299 = vmatpush3.bf16.msra.mxu1 %v1298_v56 }
  0x78   :  { %1300 = vmatprep.subr.bf16.mxu1 %v1386_v3 }
  0x79   :  { %1211 = vmatpush1.bf16.msra.mxu0 %v1210_v59  ;;  %v804_v59 = vld [vmem:[%s2220_s5 + $0x8] sm:$0xff] }
  0x7a   :  { %1213 = vmatprep.subr.bf16.mxu0 %v1212_v60  ;;  %600 = vmatmul.mubr.f32.vlgmr.msra.gmra.mrb[4].mxu1 %v29_v8  ;;  %v1319_v60 = vpack.c.bf16 %v804_v59, %v803_v58 }
  0x7b   :  { %1302 = vmatpush3.bf16.msra.mxu1 %v1301_v2  ;;  %1043 = vmatprep.mubr.msk.f32.mxu1 %vm1387_vm1, %v1385_v7  ;;  %v1325_v2 = vpack.c.bf16 %v808_v1, %v807_v0 }
  0x7c   :  { %1303 = vmatprep.subr.bf16.mxu1 %v1386_v3 }
  0x7d   :  { %1215 = vmatpush1.bf16.msra.mxu0 %v1214_v6  ;;  %v1328_v6 = vpack.c.bf16 %v810_v5, %v809_v4 }
  0x7e   :  { %1217 = vmatprep.subr.bf16.mxu0 %v1216_v9  ;;  %v812_v9 = vld [vmem:[%s2220_s5 + $0x48] sm:$0xff] }
  0x7f   :  { %1305 = vmatpush3.bf16.msra.mxu1 %v1304_v12  ;;  %v814_v12 = vld [vmem:[%s2220_s5 + $0x58] sm:$0xff] }
  0x80   :  { %1306 = vmatprep.subr.bf16.mxu1 %v1386_v3  ;;  %v1334_v13 = vpack.c.bf16 %v814_v12, %v813_v11 }
  0x81   :  { %1219 = vmatpush1.bf16.msra.mxu0 %v1218_v15  ;;  %v816_v15 = vld [vmem:[%s2220_s5 + $0x68] sm:$0xff] }
  0x83   :  { %1308 = vmatpush3.bf16.msra.mxu1 %v1307_v16  ;;  %v1337_v16 = vpack.c.bf16 %v816_v15, %v815_v14 }
  0x84   :  { %388 = vmatmul.mubr.f32.vlgmr.msra.gmra.mrb[0].mxu0 %v29_v8  ;;  %1309 = vmatprep.subr.bf16.mxu1 %v1386_v3  ;;  %v811_v8 = vld [vmem:[%s2220_s5 + $0x40] sm:$0xff] }
  0x85   :  { %v1331_v10 = vpack.c.bf16 %v812_v9, %v811_v8 }
  0x87   :  { %1311 = vmatpush3.bf16.msra.mxu1 %v1310_v18  ;;  %v1340_v18 = vpack.c.bf16 %v818_v42, %v817_v17 }
  0x88   :  { %1312 = vmatprep.subr.bf16.mxu1 %v1386_v3 }
  0x8a   :  { %1044 = vmatmul.mubr.msk.f32.vlgmr.msra.gmra.mrb[6].mxu1 %vm248_vm0, %v1694_v62  ;;  %v712_v62 = vld [vmem:[%s2218_s3] sm:$0xff] }
  0x8b   :  { %1054 = vmatprep.mubr.msk.f32.mxu1 %vm1387_vm1, %v1385_v7  ;;  %v1313_v35 = vpack.c.bf16 %v713_v33, %v712_v62 }
  0x8d   :  { %1314 = vmatpush3.bf16.msra.mxu1 %v1313_v35 }
  0x8e   :  { %1315 = vmatprep.subr.bf16.mxu1 %v1386_v3 }
  0x91   :  { %1317 = vmatpush3.bf16.msra.mxu1 %v1316_v41 }
  0x92   :  { %1318 = vmatprep.subr.bf16.mxu1 %v1386_v3 }
  0xf7   :  { %v460_v19 = vpop.f32.mrb[0].mxu1 }
  0xf8   :  { %v462_v20 = vpop.f32.mrb[1].mxu1 }
 0x12d   :  { %v958_v21 = vpop.f32.mrb[2].mxu1 }
 0x12e   :  { %v959_v22 = vpop.f32.mrb[3].mxu1 }
 0x12f   :  { %v960_v23 = vadd.f32 %v959_v22, %v958_v21 }
 0x14d   :  { %v993_v24 = vpop.f32.mrb[4].mxu1 }
 0x14e   :  { %v994_v25 = vpop.f32.mrb[5].mxu1 }
 0x14f   :  { %v995_v26 = vadd.f32 %v994_v25, %v993_v24 }
 0x151   :  { %v602_v28 = vadd.f32 %v995_v26, %v960_v23 }
 0x157   :  { %v389_v29 = vpop.f32.mrb[0].mxu0 }
 0x158   :  { %v1342_v30 = vadd.f32 %v460_v19, %v389_v29  ;;  %v391_v31 = vpop.f32.mrb[1].mxu0  ;;  %v923_v19 = vld [vmem:[%s2219_s4] ss:$0 sm:$0xff]  ;;  %s1391_s4 = smov [#allocation2]  }
 0x159   :  { %v1343_v32 = vadd.f32 %v462_v20, %v391_v31  ;;  %s912_s22 = sshll.u32 %s1391_s4, 4  ;;  %s913_s22 = int_to_ptr.vmem [resolvable:$true] %s912_s22 }
 0x15a   :  { %684 = vrot.lane.b32.xlu1 %v1342_v30, %s1388_s8  ;;  %676 = vrot.lane.b32.xlu0 %v1342_v30, %s1389_s9  ;;  %s1361_s23 = scalar_lea.vmem %s913_s22, 128  ;;  %p1366_p1 = scmp.lt.s32.totalorder %s913_s22, %s913_s22 }
 0x15b   :  { %p1362_p0 = scmp.ne.s32.totalorder %s913_s22, %s1361_s23  ;;  %p1367_p2 = scmp.lt.s32.totalorder %s1361_s23, %s1361_s23 }
 0x15d   :  { %v671_v36 = vpop.f32.mrb[6].mxu1  ;;  %p1368_p3 = por %p1367_p2, %p1366_p1 }
 0x15e   :  { %680 = vrot.lane.b32.xlu0 %v1342_v30, %s1390_s14  ;;  %690 = vrot.lane.b32.xlu1 %v1343_v32, %s1389_s9  ;;  %v672_v39 = vadd.f32 %v671_v36, %v602_v28  ;;  %v1045_v40 = vpop.f32.mrb[7].mxu1 }
 0x15f   :  { %p1369_p4 = pnand %p1368_p3, %p1362_p0 }
 0x162   :  { %694 = vrot.lane.b32.xlu0 %v1343_v32, %s1390_s14  ;;  %698 = vrot.lane.b32.xlu1 %v1343_v32, %s1388_s8 }
 0x1cc   :  { %v677_v43 = vpop.permute.xlu0 %676  ;;  %v685_v44 = vpop.permute.xlu1 %684 }
 0x1cd   :  { %v679_v45 = vmax.f32 %v1342_v30, %v677_v43 }
 0x1d0   :  { %v681_v46 = vpop.permute.xlu0 %680  ;;  %v691_v49 = vpop.permute.xlu1 %690 }
 0x1d1   :  { %v683_v47 = vmax.f32 %v679_v45, %v681_v46 }
 0x1d3   :  { %v687_v48 = vmax.f32 %v683_v47, %v685_v44 }
 0x1d4   :  { %v695_v52 = vpop.permute.xlu0 %694  ;;  %v699_v53 = vpop.permute.xlu1 %698 }
 0x1d5   :  { %v688_v50 = vmax.f32 %v687_v48, %v1343_v32 }
 0x1d7   :  { %v693_v51 = vmax.f32 %v688_v50, %v691_v49 }
 0x1d9   :  { %v697_v27 = vmax.f32 %v693_v51, %v695_v52 }
 0x1db   :  { %v701_v54 = vmax.f32 %v697_v27, %v699_v53 }
 0x1dd   :  { %v702_v55 = vmax.f32 %v701_v54, %v672_v39 }
 0x1df   :  { %v710_v56 = vadd.f32 %v922_v34, %v702_v55 }
 0x1e1   :  { %v711_v57 = vmax.f32 %v710_v56, 0.0 }
 0x1e3   :  { %1055 = vmatmul.mubr.msk.f32.vlgmr.msra.gmra.mrb[8].mxu1 %vm723_vm2, %v711_v57 }
 0x1e4   :  { %1089 = vmatprep.mubr.msk.f32.mxu1 %vm1387_vm1, %v1385_v7  ;;  %1320 = vmatpush3.bf16.msra.mxu1 %v1319_v60  ;;  %v806_v7 = vld [vmem:[%s2220_s5 + $0x18] sm:$0xff] }
 0x1e5   :  { %1321 = vmatprep.subr.bf16.mxu1 %v1386_v3  ;;  %v1322_v63 = vpack.c.bf16 %v806_v7, %v805_v61 }
 0x1e8   :  { %1323 = vmatpush3.bf16.msra.mxu1 %v1322_v63 }
 0x1e9   :  { %1324 = vmatprep.subr.bf16.mxu1 %v1386_v3 }
 0x1ec   :  { %1326 = vmatpush3.bf16.msra.mxu1 %v1325_v2 }
 0x1ed   :  { %1327 = vmatprep.subr.bf16.mxu1 %v1386_v3 }
 0x1f0   :  { %1329 = vmatpush3.bf16.msra.mxu1 %v1328_v6 }
 0x1f1   :  { %1330 = vmatprep.subr.bf16.mxu1 %v1386_v3 }
 0x1f4   :  { %1332 = vmatpush3.bf16.msra.mxu1 %v1331_v10 }
 0x1f5   :  { %1333 = vmatprep.subr.bf16.mxu1 %v1386_v3 }
 0x1f8   :  { %1335 = vmatpush3.bf16.msra.mxu1 %v1334_v13 }
 0x1f9   :  { %1336 = vmatprep.subr.bf16.mxu1 %v1386_v3 }
 0x1fc   :  { %1338 = vmatpush3.bf16.msra.mxu1 %v1337_v16 }
 0x1fd   :  { %1339 = vmatprep.subr.bf16.mxu1 %v1386_v3  ;;  %v925_v3 = vld [vmem:[%s2221_s6] ss:$0 sm:$0xff] }
 0x200   :  { %1341 = vmatpush3.bf16.msra.mxu1 %v1340_v18 }
 0x2b6   :  { %v793_v20 = vpop.f32.mrb[8].mxu1 }
 0x2b7   :  { %v794_v21 = vadd.f32 %v923_v19, %v793_v20  ;;  %v1056_v22 = vpop.f32.mrb[9].mxu1 }
 0x2b9   :  { %v797_v23 = vmax.f32 %v794_v21, 0.0 }
 0x2bb   :  { %v798_v24 = vsub.f32 0.0, %v797_v23 }
 0x2bd   :  { %v799_v25 = vmul.f32 1.442695, %v798_v24 }
 0x2bf   :  { %1353 = vpow2.f32 %v799_v25 }
 0x2c9   :  { %v1354_v26 = vpop.eup %1353 }
 0x2ca   :  { %v801_v28 = vadd.f32 1.0, %v1354_v26 }
 0x2cc   :  { %1355 = vrcp.f32 %v801_v28 }
 0x2d6   :  { %v1356_v29 = vpop.eup %1355 }
 0x2d7   :  { %1090 = vmatmul.mubr.f32.vlgmr.msra.gmra.mrb[10].mxu1 %v1356_v29 }
 0x3aa   :  { %v892_v30 = vpop.f32.mrb[10].mxu1 }
 0x3ab   :  { %v893_v31 = vadd.f32 %v925_v3, %v892_v30  ;;  %v1091_v32 = vpop.f32.mrb[11].mxu1 }
 0x3ad   :  { %896 = vmax.xlane.f32.xlu0 %v893_v31 }
 0x43a   :  { %v897_v62 = vpop.xlane.xlu0 %896 }
 0x43b   :  { %v898_v33 = vsub.f32 %v893_v31, %v897_v62 }
 0x43d   :  { %v899_v35 = vmul.f32 1.442695, %v898_v33 }
 0x43f   :  { %1357 = vpow2.f32 %v899_v35 }
 0x449   :  { %v1358_v36 = vpop.eup %1357 }
 0x44a   :  { %901 = vadd.xlane.f32.xlu1 %v1358_v36 }
 0x4d7   :  { %v902_v37 = vpop.xlane.xlu1 %901 }
 0x4d8   :  { %1359 = vrcp.f32 %v902_v37 }
 0x4e2   :  { %v1360_v38 = vpop.eup %1359 }
 0x4e3   :  { %v904_v39 = vmul.f32 %v1360_v38, %v1358_v36 }
 0x4e5   :  { %905 = vst [vmem:[#allocation2] sm:$0xff] %v904_v39 }
 0x4e6   :  { %1372 = shalt.err (!%p1369_p4)
}
 0x4e7   :  { %s1373_s25 = scalar_lea.hbm %s2222_s7, 128 }
 0x4e8   :  { %p1374_p5 = scmp.ne.s32.totalorder %s2222_s7, %s1373_s25  ;;  %p1377_p6 = scmp.lt.u32.totalorder %s1373_s25, %s2222_s7 }
 0x4ea   :  { %p1379_p7 = pnand %p1377_p6, %p1374_p5 }
 0x4ec   :  { %1382 = shalt.err (!%p1379_p7)
}
 0x4ed   :  { %915 = dma.vmem_to_hbm [thread:$0]  %s913_s22, 128, %s2222_s7, [#allocation3]  }
 0x4ee   :  { %1383 = dma.done.wait [#allocation3], 128  }
 0x4ef   :  { %1384 = vsyncadd [#allocation3], 4294967168 }
 0x4f0   :  { %919 = vsyncpa [#allocation3], 1 }

</bundles_post_ra>
